<compile_context>
chip_gen: v5e
topology: v5e:2x2
jax: 0.10.0
libtpu: 0.0.40
codegen_flags: <defaults>
</compile_context>

<pallas_src>
import functools
import math

import jax
import jax.numpy as jnp
import numpy as np
from jax import lax
from jax.experimental import pallas as pl
from jax.experimental.pallas import tpu as pltpu


def lambda_init_fn(depth):
    return 0.8 - 0.6 * math.exp(-0.3 * depth)


# ----------------------------- kernel -------------------------------------- #

def diff_attn_kernel(lam_ref, x_ref, wqkv_ref, wo_ref, y_ref, attn_ref=None, *,
                     head_dim, compute_dtype, emit_attn):
    """One (batch, head) step: fused QKV projection, differential attention,
    RMSNorm and this head's contribution to the output projection (accumulated
    into the revisited y block across the 'arbitrary' H grid axis)."""
    h = pl.program_id(1)
    hd = head_dim

    # --- fused QKV projection: single wide MXU matmul (bf16 in, f32 acc) ----
    x = x_ref[0].astype(compute_dtype)                             # [N, D]
    qkv = jnp.dot(x, wqkv_ref[0],
                  preferred_element_type=jnp.float32)              # [N, 6*hd]
    qkv_c = qkv.astype(compute_dtype)

    # Column layout of the fused weight: [q1 | q2 | k1 | k2 | v]; the softmax
    # scale is already folded into the q columns on the host.
    q1 = qkv_c[:, 0 * hd:1 * hd]
    q2 = qkv_c[:, 1 * hd:2 * hd]
    k1 = qkv_c[:, 2 * hd:3 * hd]
    k2 = qkv_c[:, 3 * hd:4 * hd]
    v = qkv_c[:, 4 * hd:6 * hd]                                    # [N, 2*hd]

    # --- attention logits: NT matmuls via dot_general (no explicit .T) ------
    nt = (((1,), (1,)), ((), ()))
    a1 = lax.dot_general(q1, k1, nt, preferred_element_type=jnp.float32)
    a2 = lax.dot_general(q2, k2, nt, preferred_element_type=jnp.float32)

    # --- one fused softmax over both branches (stacked on sublane axis) -----
    n = a1.shape[0]
    a = jnp.concatenate([a1, a2], axis=0)                          # [2N, N] f32
    a = a - jnp.max(a, axis=-1, keepdims=True)
    e = jnp.exp(a)
    p = e / jnp.sum(e, axis=-1, keepdims=True)
    attn1, attn2 = p[:n], p[n:]

    lam = lam_ref[h]                                               # scalar (SMEM)
    combined = attn1 - lam * attn2                                 # [N, N] f32
    if emit_attn:
        attn_ref[0, 0] = combined.astype(attn_ref.dtype)

    out = jnp.dot(combined.astype(compute_dtype), v,
                  preferred_element_type=jnp.float32)              # [N, 2*hd]

    # --- RMSNorm in f32 (reference RMSNorm never uses its weight param) -----
    ms = jnp.mean(out * out, axis=-1, keepdims=True)
    normed = out * lax.rsqrt(ms + 1e-6)

    # --- fused output projection: y += normed @ Wo[h] (Wo pre-scaled) -------
    @pl.when(h == 0)
    def _init():
        y_ref[...] = jnp.zeros_like(y_ref)

    y_ref[0] += jnp.dot(normed.astype(compute_dtype), wo_ref[0],
                        preferred_element_type=jnp.float32).astype(y_ref.dtype)


# ----------------------------- wrapper -------------------------------------- #

def multi_head_diff_attention(x, params, depth, *,
                              compute_dtype=jnp.bfloat16,
                              attn_dtype=jnp.float32,
                              return_attn=True):
    B, N, D = x.shape
    H = params["wq"].shape[0]
    hd = D // H
    lam_init = lambda_init_fn(depth)
    scale = hd ** (-0.5)

    # Per-head lambda scalars (tiny reduction -> plain JAX glue, fed via SMEM).
    lam = (jnp.exp(jnp.sum(params["lq1"] * params["lk1"], axis=-1))
           - jnp.exp(jnp.sum(params["lq2"] * params["lk2"], axis=-1))
           + lam_init).astype(jnp.float32)                         # [H]

    # Host-side weight fusion / pre-scaling:
    #  * one wide [D, 6*hd] QKV weight per head -> single in-kernel MXU matmul
    #    (softmax scale folded into the Q columns)
    #  * Wo reshaped per-head [2*hd, D] with (1 - lambda_init) folded in
    w_qkv = jnp.concatenate(
        [params["wq"] * scale, params["wk"], params["wv"]],
        axis=-1).astype(compute_dtype)                             # [H, D, 6*hd]
    wo_heads = (params["wo"] * (1.0 - lam_init)).reshape(
        H, 2 * hd, D).astype(compute_dtype)                        # [H, 2*hd, D]

    out_specs = [pl.BlockSpec((1, N, D), lambda b, h: (b, 0, 0))]
    out_shape = [jax.ShapeDtypeStruct((B, N, D), jnp.float32)]
    if return_attn:
        out_specs.append(pl.BlockSpec((1, 1, N, N), lambda b, h: (b, h, 0, 0)))
        out_shape.append(jax.ShapeDtypeStruct((B, H, N, N), attn_dtype))

    # Explicit VMEM budget: double-buffered blocks + headroom for intermediates.
    cb = jnp.dtype(compute_dtype).itemsize
    ab = jnp.dtype(attn_dtype).itemsize
    block_bytes = (N * D * 4) * 2 + D * 6 * hd * cb + 2 * hd * D * cb
    if return_attn:
        block_bytes += N * N * ab
    vmem_limit = int(min(max(4 * block_bytes + (8 << 20), 32 << 20), 64 << 20))

    # TODO(synk): for large N, add query/KV sequence tiling with a flash-style
    # online softmax so [N, N] blocks fit v7x's 64 MiB VMEM.
    outs = pl.pallas_call(
        functools.partial(diff_attn_kernel, head_dim=hd,
                          compute_dtype=compute_dtype, emit_attn=return_attn),
        grid=(B, H),
        in_specs=[
            pl.BlockSpec(memory_space=pltpu.MemorySpace.SMEM),       # lam [H]
            pl.BlockSpec((1, N, D), lambda b, h: (b, 0, 0)),         # x
            pl.BlockSpec((1, D, 6 * hd), lambda b, h: (h, 0, 0)),    # W_qkv[h]
            pl.BlockSpec((1, 2 * hd, D), lambda b, h: (h, 0, 0)),    # W_out[h]
        ],
        out_specs=tuple(out_specs),
        out_shape=tuple(out_shape),
        compiler_params=pltpu.CompilerParams(
            dimension_semantics=("parallel", "arbitrary"),
            vmem_limit_bytes=vmem_limit),
    )(lam, x, w_qkv, wo_heads)

    if return_attn:
        y, attn = outs
        return y, attn
    (y,) = outs
    return y, None


# ------------------------- pure-JAX reference ------------------------------- #

def reference(x, params, depth):
    lam_init = lambda_init_fn(depth)
    B, N, D = x.shape
    H = params["wq"].shape[0]
    hd = D // H
    outs, attns = [], []
    for h in range(H):
        q = x @ params["wq"][h]
        k = x @ params["wk"][h]
        v = x @ params["wv"][h]
        q1, q2 = q[..., :hd], q[..., hd:]
        k1, k2 = k[..., :hd], k[..., hd:]
        scale = hd ** (-0.5)
        a1 = jnp.einsum("bnd,bmd->bnm", q1, k1) * scale
        a2 = jnp.einsum("bnd,bmd->bnm", q2, k2) * scale
        attn1 = jax.nn.softmax(a1, -1)
        attn2 = jax.nn.softmax(a2, -1)
        l1 = jnp.exp(jnp.sum(params["lq1"][h] * params["lk1"][h]))
        l2 = jnp.exp(jnp.sum(params["lq2"][h] * params["lk2"][h]))
        lam = l1 - l2 + lam_init
        comb = attn1 - lam * attn2
        out = comb @ v
        normed = out * jax.lax.rsqrt(jnp.mean(out ** 2, -1, keepdims=True) + 1e-6)
        outs.append(normed)
        attns.append(comb)
    o = jnp.concatenate(outs, -1) * (1.0 - lam_init)
    y = o @ params["wo"]
    return y, jnp.stack(attns, 1)


# ------------------------------ main ----------------------------------------- #

if __name__ == "__main__":
    B, N, D, H, depth = 2, 16, 32, 4, 2
    hd = D // H

    key = jax.random.PRNGKey(0)
    ks = jax.random.split(key, 10)
    params = {
        "wq": 0.1 * jax.random.normal(ks[0], (H, D, 2 * hd), jnp.float32),
        "wk": 0.1 * jax.random.normal(ks[1], (H, D, 2 * hd), jnp.float32),
        "wv": 0.1 * jax.random.normal(ks[2], (H, D, 2 * hd), jnp.float32),
        "wo": 0.1 * jax.random.normal(ks[3], (2 * D, D), jnp.float32),
        "lq1": 0.1 * jax.random.normal(ks[4], (H, hd), jnp.float32),
        "lq2": 0.1 * jax.random.normal(ks[5], (H, hd), jnp.float32),
        "lk1": 0.1 * jax.random.normal(ks[6], (H, hd), jnp.float32),
        "lk2": 0.1 * jax.random.normal(ks[7], (H, hd), jnp.float32),
    }
    x = jax.random.normal(ks[8], (B, N, D), jnp.float32)

    y_ref, attn_ref_vals = reference(x, params, depth)

    # f32 compute path: tight correctness check against the pure-JAX reference.
    y32, a32 = multi_head_diff_attention(
        x, params, depth, compute_dtype=jnp.float32, attn_dtype=jnp.float32)
    jax.block_until_ready((y32, a32))
    np.testing.assert_allclose(np.asarray(y32), np.asarray(y_ref),
                               rtol=2e-5, atol=2e-5)
    np.testing.assert_allclose(np.asarray(a32), np.asarray(attn_ref_vals),
                               rtol=2e-5, atol=2e-5)

    # bf16 MXU path (performance default): looser tolerance, bf16 attn maps.
    y16, a16 = multi_head_diff_attention(
        x, params, depth, compute_dtype=jnp.bfloat16, attn_dtype=jnp.bfloat16)
    jax.block_until_ready((y16, a16))
    np.testing.assert_allclose(np.asarray(y16), np.asarray(y_ref),
                               rtol=3e-2, atol=3e-2)
    np.testing.assert_allclose(np.asarray(a16.astype(jnp.float32)),
                               np.asarray(attn_ref_vals), rtol=3e-2, atol=3e-2)

    print("KERNEL_OK")
</pallas_src>

<mosaic_0001>
module attributes {stable_mosaic.version = 11 : i64} {
  func.func @diff_attn_kernel(%arg0: i32, %arg1: i32, %arg2: memref<4xf32, #tpu.memory_space<smem>>, %arg3: memref<1x16x32xf32, #tpu.memory_space<vmem>>, %arg4: memref<1x32x48xf32, #tpu.memory_space<vmem>>, %arg5: memref<1x16x32xf32, #tpu.memory_space<vmem>>, %arg6: memref<1x16x32xf32, #tpu.memory_space<vmem>>, %arg7: memref<1x1x16x16xf32, #tpu.memory_space<vmem>>) attributes {dimension_semantics = [#tpu.dimension_semantics<parallel>, #tpu.dimension_semantics<arbitrary>], iteration_bounds = array<i64: 2, 4>, scalar_prefetch = 0 : i64, scratch_operands = 0 : i64, tpu.core_type = #tpu.core_type<tc>, window_params = [{transform_indices = @transform_0, window_bounds = array<i64: 4>}, {transform_indices = @transform_1, window_bounds = array<i64: 1, 16, 32>}, {transform_indices = @transform_2, window_bounds = array<i64: 1, 32, 48>}, {transform_indices = @transform_3, window_bounds = array<i64: 1, 16, 32>}, {transform_indices = @transform_4, window_bounds = array<i64: 1, 16, 32>}, {transform_indices = @transform_5, window_bounds = array<i64: 1, 1, 16, 16>}]} {
    %c0 = arith.constant 0 : index
    %c0_0 = arith.constant 0 : index
    %c0_1 = arith.constant 0 : index
    %0 = vector.load %arg3[%c0, %c0_0, %c0_1] : memref<1x16x32xf32, #tpu.memory_space<vmem>>, vector<1x16x32xf32>
    %1 = vector.shape_cast %0 : vector<1x16x32xf32> to vector<16x32xf32>
    %c0_2 = arith.constant 0 : index
    %c0_3 = arith.constant 0 : index
    %c0_4 = arith.constant 0 : index
    %2 = vector.load %arg4[%c0_2, %c0_3, %c0_4] : memref<1x32x48xf32, #tpu.memory_space<vmem>>, vector<1x32x48xf32>
    %3 = vector.shape_cast %2 : vector<1x32x48xf32> to vector<32x48xf32>
    %cst = arith.constant dense<0.000000e+00> : vector<16x48xf32>
    %4 = tpu.matmul %1, %3, %cst {dimension_numbers = #tpu.dot_dimension_numbers<[1], [0], [0], [1], [0, 0, 1, 1], [], []>} : vector<16x32xf32>, vector<32x48xf32>, vector<16x48xf32> -> vector<16x48xf32>
    %5 = vector.extract_strided_slice %4 {offsets = [0, 0], sizes = [16, 8], strides = [1, 1]} : vector<16x48xf32> to vector<16x8xf32>
    %6 = vector.extract_strided_slice %4 {offsets = [0, 8], sizes = [16, 8], strides = [1, 1]} : vector<16x48xf32> to vector<16x8xf32>
    %7 = vector.extract_strided_slice %4 {offsets = [0, 16], sizes = [16, 8], strides = [1, 1]} : vector<16x48xf32> to vector<16x8xf32>
    %8 = vector.extract_strided_slice %4 {offsets = [0, 24], sizes = [16, 8], strides = [1, 1]} : vector<16x48xf32> to vector<16x8xf32>
    %9 = vector.extract_strided_slice %4 {offsets = [0, 32], sizes = [16, 16], strides = [1, 1]} : vector<16x48xf32> to vector<16x16xf32>
    %cst_5 = arith.constant dense<0.000000e+00> : vector<16x16xf32>
    %10 = tpu.matmul %5, %7, %cst_5 {dimension_numbers = #tpu.dot_dimension_numbers<[1], [1], [0], [0], [0, 0, 1, 0], [], []>} : vector<16x8xf32>, vector<16x8xf32>, vector<16x16xf32> -> vector<16x16xf32>
    %cst_6 = arith.constant dense<0.000000e+00> : vector<16x16xf32>
    %11 = tpu.matmul %6, %8, %cst_6 {dimension_numbers = #tpu.dot_dimension_numbers<[1], [1], [0], [0], [0, 0, 1, 0], [], []>} : vector<16x8xf32>, vector<16x8xf32>, vector<16x16xf32> -> vector<16x16xf32>
    %12 = tpu.concatenate %10, %11 in 0 : vector<16x16xf32>, vector<16x16xf32> -> vector<32x16xf32>
    %cst_7 = arith.constant dense<0xFF800000> : vector<32xf32>
    %13 = vector.multi_reduction <maximumf>, %12, %cst_7 [1] : vector<32x16xf32> to vector<32xf32>
    %14 = vector.shape_cast %13 : vector<32xf32> to vector<32x1xf32>
    %15 = vector.broadcast %14 : vector<32x1xf32> to vector<32x16xf32>
    %16 = arith.subf %12, %15 : vector<32x16xf32>
    %17 = math.exp %16 : vector<32x16xf32>
    %cst_8 = arith.constant dense<0.000000e+00> : vector<32xf32>
    %18 = vector.multi_reduction <add>, %17, %cst_8 [1] : vector<32x16xf32> to vector<32xf32>
    %19 = vector.shape_cast %18 : vector<32xf32> to vector<32x1xf32>
    %20 = vector.broadcast %19 : vector<32x1xf32> to vector<32x16xf32>
    %21 = arith.divf %17, %20 : vector<32x16xf32>
    %22 = vector.extract_strided_slice %21 {offsets = [0, 0], sizes = [16, 16], strides = [1, 1]} : vector<32x16xf32> to vector<16x16xf32>
    %23 = vector.extract_strided_slice %21 {offsets = [16, 0], sizes = [16, 16], strides = [1, 1]} : vector<32x16xf32> to vector<16x16xf32>
    %24 = arith.index_cast %arg1 : i32 to index
    %25 = memref.load %arg2[%24] : memref<4xf32, #tpu.memory_space<smem>>
    %26 = vector.broadcast %25 : f32 to vector<16x16xf32>
    %27 = arith.mulf %26, %23 : vector<16x16xf32>
    %28 = arith.subf %22, %27 : vector<16x16xf32>
    %c0_9 = arith.constant 0 : index
    %c0_10 = arith.constant 0 : index
    %c0_11 = arith.constant 0 : index
    %c0_12 = arith.constant 0 : index
    %29 = vector.load %arg7[%c0_9, %c0_10, %c0_11, %c0_12] : memref<1x1x16x16xf32, #tpu.memory_space<vmem>>, vector<1x1x16x16xf32>
    %30 = vector.shape_cast %29 : vector<1x1x16x16xf32> to vector<16x16xf32>
    %31 = vector.shape_cast %28 : vector<16x16xf32> to vector<1x1x16x16xf32>
    tpu.vector_store %arg7[%c0_9, %c0_10, %c0_11, %c0_12], %31 {strides = array<i32>} : memref<1x1x16x16xf32, #tpu.memory_space<vmem>>, vector<1x1x16x16xf32>,
    %cst_13 = arith.constant dense<0.000000e+00> : vector<16x16xf32>
    %32 = tpu.matmul %28, %9, %cst_13 {dimension_numbers = #tpu.dot_dimension_numbers<[1], [0], [0], [1], [0, 0, 1, 1], [], []>} : vector<16x16xf32>, vector<16x16xf32>, vector<16x16xf32> -> vector<16x16xf32>
    %33 = arith.mulf %32, %32 : vector<16x16xf32>
    %cst_14 = arith.constant dense<0.000000e+00> : vector<16xf32>
    %34 = vector.multi_reduction <add>, %33, %cst_14 [1] : vector<16x16xf32> to vector<16xf32>
    %35 = vector.shape_cast %34 : vector<16xf32> to vector<16x1xf32>
    %cst_15 = arith.constant 1.600000e+01 : f32
    %36 = vector.broadcast %cst_15 : f32 to vector<16x1xf32>
    %37 = arith.divf %35, %36 : vector<16x1xf32>
    %cst_16 = arith.constant 9.99999997E-7 : f32
    %38 = vector.broadcast %cst_16 : f32 to vector<16x1xf32>
    %39 = arith.addf %37, %38 : vector<16x1xf32>
    %40 = math.rsqrt %39 : vector<16x1xf32>
    %41 = vector.broadcast %40 : vector<16x1xf32> to vector<16x16xf32>
    %42 = arith.mulf %32, %41 : vector<16x16xf32>
    %c0_i32 = arith.constant 0 : i32
    %43 = arith.cmpi eq, %arg1, %c0_i32 : i32
    %44 = arith.extui %43 : i1 to i32
    %c0_i32_17 = arith.constant 0 : i32
    %45 = arith.cmpi ne, %44, %c0_i32_17 : i32
    scf.if %45 {
      %cst_28 = arith.constant 0.000000e+00 : f32
      %55 = vector.broadcast %cst_28 : f32 to vector<1x16x32xf32>
      %c0_29 = arith.constant 0 : index
      %c0_30 = arith.constant 0 : index
      %c0_31 = arith.constant 0 : index
      %56 = vector.load %arg6[%c0_29, %c0_30, %c0_31] : memref<1x16x32xf32, #tpu.memory_space<vmem>>, vector<1x16x32xf32>
      tpu.vector_store %arg6[%c0_29, %c0_30, %c0_31], %55 {strides = array<i32>} : memref<1x16x32xf32, #tpu.memory_space<vmem>>, vector<1x16x32xf32>,
    } else {
    }
    %c0_18 = arith.constant 0 : index
    %c0_19 = arith.constant 0 : index
    %c0_20 = arith.constant 0 : index
    %46 = vector.load %arg6[%c0_18, %c0_19, %c0_20] : memref<1x16x32xf32, #tpu.memory_space<vmem>>, vector<1x16x32xf32>
    %47 = vector.shape_cast %46 : vector<1x16x32xf32> to vector<16x32xf32>
    %c0_21 = arith.constant 0 : index
    %c0_22 = arith.constant 0 : index
    %c0_23 = arith.constant 0 : index
    %48 = vector.load %arg5[%c0_21, %c0_22, %c0_23] : memref<1x16x32xf32, #tpu.memory_space<vmem>>, vector<1x16x32xf32>
    %49 = vector.shape_cast %48 : vector<1x16x32xf32> to vector<16x32xf32>
    %cst_24 = arith.constant dense<0.000000e+00> : vector<16x32xf32>
    %50 = tpu.matmul %42, %49, %cst_24 {dimension_numbers = #tpu.dot_dimension_numbers<[1], [0], [0], [1], [0, 0, 1, 1], [], []>} : vector<16x16xf32>, vector<16x32xf32>, vector<16x32xf32> -> vector<16x32xf32>
    %51 = arith.addf %47, %50 : vector<16x32xf32>
    %c0_25 = arith.constant 0 : index
    %c0_26 = arith.constant 0 : index
    %c0_27 = arith.constant 0 : index
    %52 = vector.load %arg6[%c0_25, %c0_26, %c0_27] : memref<1x16x32xf32, #tpu.memory_space<vmem>>, vector<1x16x32xf32>
    %53 = vector.shape_cast %52 : vector<1x16x32xf32> to vector<16x32xf32>
    %54 = vector.shape_cast %51 : vector<16x32xf32> to vector<1x16x32xf32>
    tpu.vector_store %arg6[%c0_25, %c0_26, %c0_27], %54 {strides = array<i32>} : memref<1x16x32xf32, #tpu.memory_space<vmem>>, vector<1x16x32xf32>,
    return
  }
  func.func @transform_0(%arg0: i32, %arg1: i32) -> i32 {
    %c0_i32 = arith.constant 0 : i32
    %c0_i32_0 = arith.constant 0 : i32
    return %c0_i32 : i32
  }
  func.func @transform_1(%arg0: i32, %arg1: i32) -> (i32, i32, i32) {
    %c0_i32 = arith.constant 0 : i32
    %c0_i32_0 = arith.constant 0 : i32
    %c0_i32_1 = arith.constant 0 : i32
    return %arg0, %c0_i32, %c0_i32_0 : i32, i32, i32
  }
  func.func @transform_2(%arg0: i32, %arg1: i32) -> (i32, i32, i32) {
    %c0_i32 = arith.constant 0 : i32
    %c0_i32_0 = arith.constant 0 : i32
    %c0_i32_1 = arith.constant 0 : i32
    return %arg1, %c0_i32, %c0_i32_0 : i32, i32, i32
  }
  func.func @transform_3(%arg0: i32, %arg1: i32) -> (i32, i32, i32) {
    %c0_i32 = arith.constant 0 : i32
    %c0_i32_0 = arith.constant 0 : i32
    %c0_i32_1 = arith.constant 0 : i32
    return %arg1, %c0_i32, %c0_i32_0 : i32, i32, i32
  }
  func.func @transform_4(%arg0: i32, %arg1: i32) -> (i32, i32, i32) {
    %c0_i32 = arith.constant 0 : i32
    %c0_i32_0 = arith.constant 0 : i32
    %c0_i32_1 = arith.constant 0 : i32
    return %arg0, %c0_i32, %c0_i32_0 : i32, i32, i32
  }
  func.func @transform_5(%arg0: i32, %arg1: i32) -> (i32, i32, i32, i32) {
    %c0_i32 = arith.constant 0 : i32
    %c0_i32_0 = arith.constant 0 : i32
    %c0_i32_1 = arith.constant 0 : i32
    return %arg0, %arg1, %c0_i32, %c0_i32_0 : i32, i32, i32, i32
  }
}

</mosaic_0001>

<bundles_post_ra>
// kernel: tpu_custom_call.1
= control target key start
LH: loop header
LB: loop body
LE: loop exit
PB: predicated region body
PF: predicated region fallthrough
CT: control target
= control target key end

     0   :  { %s1940_s0 = inlined_call_operand.hbm [shape: f32[4], index: 0, kind: input, shape index: {}]   ;;  %s1941_s1 = inlined_call_operand.hbm [shape: f32[2,16,32], index: 1, kind: input, shape index: {}]   ;;  %s1942_s2 = inlined_call_operand.hbm [shape: f32[4,32,48], index: 2, kind: input, shape index: {}]   ;;  %s1943_s3 = inlined_call_operand.hbm [shape: f32[4,16,32], index: 3, kind: input, shape index: {}]   ;;  %s1944_s4 = inlined_call_operand.hbm [shape: f32[2,16,32], index: 4, kind: output, shape index: {0}]   ;;  %s1945_s5 = inlined_call_operand.hbm [shape: f32[2,4,16,16], index: 5, kind: output, shape index: {1}]  }
   0x1   :  { %1975 = sst [smem:[#allocation33_spill]] %s1940_s0 }
   0x2   :  { %1976 = sst [smem:[#allocation34_spill]] %s1941_s1 }
   0x3   :  { %1977 = sst [smem:[#allocation35_spill]] %s1942_s2 }
   0x4   :  { %1978 = sst [smem:[#allocation36_spill]] %s1944_s4 }
   0x5   :  { %1979 = sst [smem:[#allocation37_spill]] %s1945_s5 }
   0x6   :  { %11 = vsyncpa [#allocation5], 0 }
   0x7   :  { %12 = vsyncpa [#allocation3], 0 }
   0x8   :  { %14 = vsyncpa [#allocation3 + $0x1], 0 }
   0x9   :  { %15 = vsyncpa [#allocation8], 0 }
   0xa   :  { %17 = vsyncpa [#allocation8 + $0x1], 0 }
   0xb   :  { %18 = vsyncpa [#allocation4], 0 }
   0xc   :  { %20 = vsyncpa [#allocation4 + $0x1], 0 }
   0xd   :  { %21 = vsyncpa [#allocation12], 0 }
   0xe   :  { %23 = vsyncpa [#allocation12 + $0x1], 0  ;;  %s1491_s18 = smov 0   ;;  %s1493_s19 = smov 0  }
   0xf   :  { %s1495_s20 = smov 0   ;;  %s1497_s21 = smov 0  }
  0x10   :  { %s1499_s22 = smov 0   ;;  %s1501_s23 = smov 0  }
  0x11   :  { %s1503_s24 = smov 0   ;;  %s1505_s25 = smov 0  }
  0x12   :  { %s1507_s26 = smov 0   ;;  %s1509_s27 = smov 0  }
  0x13   :  { %s1511_s28 = smov 0   ;;  %s1513_s29 = smov 0  }
  0x14   :  { %s1515_s30 = smov 0   ;;  %s1517_s6 = smov 0  }
  0x15 LB: > { %1980 = sst [smem:[#allocation18_spill]] %s1396_s18  ;;  %s38_s7 = sadd.s32 1, %s1440_s29  ;;  %s1448_s6 = sphi %s1517_s6, %s29_s6   ;;  %s1444_s30 = sphi %s1515_s30, %s2056_s30   ;;  %s1440_s29 = sphi %s1513_s29, %s2055_s29   ;;  %s1436_s28 = sphi %s1511_s28, %s2054_s28   ;;  %s1432_s27 = sphi %s1509_s27, %s2053_s27   ;;  %s1428_s26 = sphi %s1507_s26, %s2052_s26   ;;  %s1424_s25 = sphi %s1505_s25, %s2051_s25   ;;  %s1420_s24 = sphi %s1503_s24, %s2050_s24   ;;  %s1416_s23 = sphi %s1501_s23, %s2045_s23   ;;  %s1412_s22 = sphi %s1499_s22, %s2044_s22   ;;  %s1408_s21 = sphi %s1497_s21, %s2043_s21   ;;  %s1404_s20 = sphi %s1495_s20, %s2049_s20   ;;  %s1400_s19 = sphi %s1493_s19, %s2048_s19   ;;  %s1396_s18 = sphi %s1491_s18, %s2042_s18  }
  0x16   : > { %1981 = sst [smem:[#allocation19_spill]] %s1400_s19  ;;  %p1952_p0 = scmp.eq.s32.totalorder %s1448_s6, 0 }
  0x17   : > { %1982 = sst [smem:[#allocation20_spill]] %s1412_s22  ;;  %p1563_p1 = scmp.ge.s32.totalorder %s38_s7, 4 }
  0x18   : > { %1983 = sst [smem:[#allocation21_spill]] %s1416_s23  ;;  %s95_s9 = sadd.s32 1, %s1416_s23 }
  0x19   : > { %1984 = sst [smem:[#allocation22_spill]] %s1420_s24  ;;  %p102_p2 = scmp.ne.s32.totalorder %s1416_s23, %s1412_s22 }
  0x1a   : > { %1985 = sst [smem:[#allocation23_spill]] %s1432_s27  ;;  %s2058_s7 = smov (%p1563_p1, %s38_s7), 0 }
  0x1b   : > { %1986 = sst [smem:[#allocation24_spill]] %s1436_s28  ;;  %p1576_p3 = por %p102_p2, %p1952_p0 }
  0x1c   : > { %1988 = sst [smem:[#allocation25_spill]] %s2058_s7  ;;  %p1951_p4 = scmp.lt.s32.totalorder %s1448_s6, 8 }
  0x1d   : > { %s1583_s11 = ssub.s32 %s1440_s29, %s2058_s7  ;;  %s244_s12 = sand.u32 1, %s1448_s6  }
  0x1e   : > { %p93_p5 = scmp.eq.s32.totalorder %s1583_s11, 0  ;;  %s246_s13 = sand.u32 1, %s1416_s23  }
  0x1f   : > { %s925_s15 = sshll.u32 %s246_s13, 5  ;;  %s963_s16 = sshll.u32 %s1440_s29, 5 }
  0x20   : > { %s1589_s14 = scalar_select %p93_p5, %s1416_s23, %s95_s9  }
  0x21   : > { %s1991_s2 = sld [smem:[#allocation35_spill]]  ;;  %s248_s28 = scalar_lea.vmem [#allocation7], %s925_s15 }
  0x22   : > { %1990 = sst [smem:[#allocation26_spill]] %s1589_s14  ;;  %s256_s27 = sshll.u32 %s248_s28, 4  ;;  %s257_s27 = int_to_ptr.vmem [resolvable:$true] %s256_s27 }
  0x23   : > { %p1599_p6 = pnand %p1951_p4, %p1576_p3  ;;  %s928_s14 = sshll.u32 %s246_s13, 4 }
  0x24   : > { %s1603_s4 = scalar_lea.sflag [#allocation8], %s244_s12  ;;  %s1956_s28 = smov 8  }
  0x25   : > { %s1614_s13 = sadd.s32 4294967295, %s1448_s6   ;;  %s918_s12 = sadd.s32 4294967294, %s1448_s6  }
  0x26   : > { %p82_p7 = scmp.ne.s32.totalorder %s1424_s25, %s1420_s24  ;;  %p1953_p8 = scmp.eq.s32.totalorder %s1614_s13, 0 }
  0x27   : > { %s253_s5 = scalar_lea.hbm %s1991_s2, %s963_s16  ;;  %s1954_s16 = smov 128  }
  0x28   : > { %s254_s7 = sshll.u32 %s253_s5, 4  ;;  %s270_s5 = scalar_lea.vmem [#allocation9], %s928_s14  ;;  %s255_s7 = int_to_ptr.hbm [resolvable:$true] %s254_s7 }
  0x29   : > { %992 = dma.hbm_to_vmem [thread:$0]  (!%p1599_p6), %s255_s7, 512, %s257_s27, %s1603_s4, %s1954_s16, %s1954_s16, %s1956_s28  }
  0x2a   : > { %s1611_s10 = sshll.u32 %s270_s5, 4  ;;  %p108_p9 = scmp.ne.s32.totalorder %s1412_s22, %s1408_s21  ;;  %s279_s10 = int_to_ptr.vmem [resolvable:$true] %s1611_s10 }
  0x2b   : > { %p1958_p10 = scmp.eq.s32.totalorder %s1614_s13, 7  ;;  %p1625_p11 = por %p1953_p8, %p82_p7 }
  0x2c   : > { %p164_p12 = scmp.eq.s32.totalorder %s918_s12, 7  ;;  %p1631_p13 = por %p108_p9, %p1953_p8 }
  0x2d   : > { %s1993_s27 = scalar_select %p1625_p11, 1, 0 }
  0x2e   : > { %s1995_s7 = scalar_select %p1631_p13, 1, 0 }
  0x2f   : > { %1994 = sst [smem:[#allocation27_spill]] %s1993_s27  ;;  %p1636_p2 = por %p164_p12, %p82_p7 }
  0x30   : > { %1996 = sst [smem:[#allocation28_spill]] %s1995_s7  ;;  %p185_p3 = scmp.ne.s32.totalorder %s1404_s20, %s1400_s19 }
  0x31   : > { %s1997_s21 = scalar_select %p1636_p2, 1, 0 }
  0x32   : > { %p191_p5 = scmp.ne.s32.totalorder %s1400_s19, %s1396_s18  ;;  %p919_p4 = scmp.ge.s32.totalorder %s1448_s6, 1 }
  0x33   : > { %1998 = sst [smem:[#allocation29_spill]] %s1997_s21  ;;  %p1647_p0 = por %p185_p3, %p1958_p10 }
  0x34   : > { %p199_p9 = scmp.lt.s32.totalorder %s1448_s6, 9  ;;  %p1652_p8 = por %p191_p5, %p164_p12 }
  0x35   : > { %s1999_s15 = scalar_select %p1647_p0, 1, 0 }
  0x36   : > { %s2001_s17 = scalar_select %p1652_p8, 1, 0 }
  0x37   : > { %2000 = sst [smem:[#allocation30_spill]] %s1999_s15  ;;  %p1656_p7 = pnand %p919_p4, %p199_p9 }
  0x38   : > { %2002 = sst [smem:[#allocation31_spill]] %s2001_s17  ;;  %p2005_p10 = scmp.eq.s32.totalorder %s1614_s13, 0 }
  0x39   : > { %s2004_s0 = sld [smem:[#allocation33_spill]]  ;;  %p982_p3 = pneg %p1656_p7 }
  0x3a   : > { %s41_s14 = sadd.s32 1, %s1444_s30  ;;  %s69_s2 = sadd.s32 1, %s1428_s26 }
  0x3b   : > { %p983_p2 = pnand %p982_p3, %p2005_p10  ;;  %p76_p12 = scmp.ne.s32.totalorder %s1428_s26, %s1424_s25 }
  0x3c   : > { %s1452_s23 = smov [#allocation2]   ;;  %s2060_s14 = smov (!%p1563_p1, %s41_s14), %s1444_s30 }
  0x3d   : > { %p2006_p4 = scmp.eq.s32.totalorder %s1448_s6, 0  ;;  %p2008_p9 = scmp.eq.s32.totalorder %s1614_s13, 7 }
  0x3e   : > { %p43_p10 = scmp.ge.s32.totalorder %s2060_s14, 2  ;;  %s2011_s1 = sld [smem:[#allocation34_spill]] }
  0x3f   : > { %s211_s28 = sshll.u32 %s2004_s0, 4  ;;  %p1676_p5 = por %p2006_p4, %p76_p12  ;;  %s212_s28 = int_to_ptr.hbm [resolvable:$true] %s211_s28 }
  0x40   : > { %985 = dma.hbm_to_smem (!%p983_p2), %s212_s28, 16, %s1452_s23, [#allocation5]  }
  0x41   : > { %p1682_p8 = por %p2008_p9, %p76_p12  ;;  %s222_s0 = sand.u32 1, %s1428_s26  }
  0x42   : > { %s922_s17 = sshll.u32 %s222_s0, 4  ;;  %s2062_s14 = smov (%p43_p10, %s2060_s14), 0 }
  0x43   : > { %s2009_s12 = scalar_select %p1682_p8, 1, 0 }
  0x44   : > { %s962_s23 = sshll.u32 %s1444_s30, 4  ;;  %s66_s8 = ssub.s32 %s1444_s30, %s2062_s14 }
  0x45   : > { %2010 = sst [smem:[#allocation32_spill]] %s2009_s12  ;;  %s231_s21 = scalar_lea.hbm %s2011_s1, %s962_s23 }
  0x46   : > { %p67_p1 = scmp.eq.s32.totalorder %s66_s8, 0  ;;  %s172_s24 = sor.u32 %s1583_s11, %s66_s8 }
  0x47   : > { %p173_p2 = scmp.eq.s32.totalorder %s172_s24, 0  ;;  %s232_s12 = sshll.u32 %s231_s21, 4  ;;  %s233_s12 = int_to_ptr.hbm [resolvable:$true] %s232_s12 }
  0x48   : > { %s1697_s15 = scalar_select %p67_p1, %s1428_s26, %s69_s2  }
  0x49   : > { %s2012_s19 = sadd.s32 1, %s1404_s20  ;;  %s226_s22 = scalar_lea.vmem [#allocation6], %s922_s17 }
  0x4a   : > { %s1702_s7 = scalar_select %p173_p2, %s1404_s20, %s2012_s19  }
  0x4b   : > { %s234_s27 = sshll.u32 %s226_s22, 4  ;;  %p2013_p3 = scmp.lt.s32.totalorder %s1448_s6, 8  ;;  %s235_s27 = int_to_ptr.vmem [resolvable:$true] %s234_s27 }
  0x4c   : > { %s964_s18 = sshll.u32 %s1440_s29, 4  ;;  %s223_s8 = scalar_lea.sflag [#allocation3], %s222_s0 }
  0x4d   : > { %p987_p12 = pnand %p2013_p3, %p1676_p5  ;;  %s275_s24 = scalar_lea.hbm %s1943_s3, %s964_s18 }
  0x4e   : > { %s2014_s21 = smov 8   ;;  %s2015_s2 = smov 128  }
  0x4f   : > { %989 = dma.hbm_to_vmem [thread:$0]  (!%p987_p12), %s233_s12, 256, %s235_s27, %s223_s8, %s2015_s2, %s2015_s2, %s2014_s21  }
  0x50   : > { %s276_s19 = sshll.u32 %s275_s24, 4  ;;  %290 = sbr.rel (%p1656_p7) target bundleno = 1207 (0x4b7), region = 36  ;;  %s277_s19 = int_to_ptr.hbm [resolvable:$true] %s276_s19 }
  0x51   : > { %995 = dma.hbm_to_vmem [thread:$0]  (!%p1599_p6), %s277_s19, 256, %s279_s10, %s1603_s4, %s2015_s2, %s2015_s2, %s2014_s21  }
  0x52   : > { %p2016_p4 = scmp.eq.s32.totalorder (!%p1656_p7), %s1614_s13, 0 }
  0x55   : > { %1375 = dma.done.wait (%p2016_p4), [#allocation5], 16   ;;  %p2017_p5 = pmov %p2016_p4 }
  0x56   : > { %s1729_s22 = sand.u32 1, %s1424_s25  }
  0x57   : > { %1377 = vsyncadd (%p2017_p5), [#allocation5], 4294967280  ;;  %s933_s9 = sshll.u32 %s1729_s22, 4  ;;  %s298_s27 = scalar_lea.sflag [#allocation3], %s1729_s22 }
  0x58   : > { %s301_s4 = scalar_lea.vmem [#allocation6], %s933_s9 }
  0x59   : > { %1379 = dma.done.wait (%p1625_p11), %s298_s27, 256  }
  0x5a   : > { %1381 = vsyncadd (%p1625_p11), %s298_s27, 4294967040  ;;  %s2019_s10 = sld [smem:[#allocation20_spill]]  ;;  %s307_s5 = sand.u32 1, %s1614_s13  }
  0x5b   : > { %s308_s28 = scalar_lea.sflag [#allocation8], %s307_s5 }
  0x60   : > { %s309_s16 = sand.u32 1, %s2019_s10  }
  0x61   : > { %s934_s12 = sshll.u32 %s309_s16, 5 }
  0x62   : > { %s311_s18 = scalar_lea.vmem [#allocation7], %s934_s12 }
  0x63   : > { %1383 = dma.done.wait (%p1631_p13), %s308_s28, 768  }
  0x64   : > { %1385 = vsyncadd (%p1631_p13), %s308_s28, 4294966528  ;;  %s1745_s23 = sshll.u32 %s309_s16, 4 }
  0x65   : > { %s321_s11 = scalar_lea.vmem [#allocation9], %s1745_s23 }
  0x66   : > { %327 = sfence }
  0x67   : > { %v370_v0 = vld [vmem:[%s311_s18 + $0x18] sm:$0xff]  ;;  %v369_v1 = vld [vmem:[%s311_s18 + $0x10] sm:$0xff]  ;;  %v368_v2 = vld [vmem:[%s311_s18 + $0x8] sm:$0xff]  ;;  %vm371_vm0 = vcmask 261120   ;;  %s1453_s13 = smov 112   ;;  %s1454_s24 = smov 120  }
  0x68   : > { %390 = vmatpush.msra.mxu0 %v370_v0  ;;  %v367_v3 = vld [vmem:[%s311_s18] sm:$0xff]  ;;  %v366_v5 = vld [vmem:[%s301_s4 + $0x8] sm:$0xff]  ;;  %s1455_s8 = smov 104   ;;  %vm407_vm1 = vcmask 64512   ;;  %vm478_vm2 = vcmask 130048   ;;  %s1456_s21 = smov 96  }
  0x69   : > { %v365_v4 = vld [vmem:[%s301_s4] sm:$0xff]  ;;  %s2021_s2 = sld [smem:[#allocation23_spill]]  ;;  %s1826_s17 = scalar_lea.vmem [#allocation10], %s933_s9 }
  0x6a   : > { %391 = vmatpush.msra.mxu0 %v369_v1  ;;  %s2024_s0 = sld [smem:[#allocation19_spill]] }
  0x6c   : > { %392 = vmatpush.msra.mxu0 %v368_v2 }
  0x6e   : > { %393 = vmatpush.msra.mxu0 %v367_v3 }
  0x6f   : > { %938 = vmatmul.msk.f32.vlgmr.msra.gmra.mxu0 %vm371_vm0, %v365_v4  ;;  %s1788_s19 = sld [smem:[#allocation2 + %s2021_s2]]  ;;  %p950_p6 = scmp.ne.s32.totalorder %s2021_s2, 0 }
  0x70   : > { %s362_s27 = sand.u32 1, %s2024_s0  }
  0x71   : > { %s937_s4 = sshll.u32 %s362_s27, 4 }
  0x72   : > { %s1813_s10 = scalar_lea.vmem [#allocation11], %s937_s4 }
  0x77   : > { %939 = vmatmul.msk.f32.gmra.mxu0 %vm371_vm0, %v366_v5 }
  0xec   : > { %v1750_v6 = vpop.f32.mrf.mxu0 }
  0xed   : > { %403 = vrot.lane.b32.xlu2 %v1750_v6, %s1453_s13  ;;  %439 = vrot.lane.b32.xlu1 %v1750_v6, %s1454_s24 }
  0xf4   : > { %v1754_v7 = vpop.f32.mrf.mxu0 }
  0xf5   : > { %441 = vrot.lane.b32.xlu2 %v1754_v7, %s1454_s24  ;;  %405 = vrot.lane.b32.xlu1 %v1754_v7, %s1453_s13  ;;  %v1130_v42 = vpack.i.bf16 %v1750_v6, %v1754_v7 }
  0xf6   : > { %445 = vrot.lane.b32.xlu0 %v1754_v7, %s1455_s8 }
  0xfe   : > { %443 = vrot.lane.b32.xlu0 %v1750_v6, %s1455_s8 }
 0x147   : > { %v404_v11 = vpop.permute.xlu2 %403 }
 0x14f   : > { %v442_v13 = vpop.permute.xlu2 %441 }
 0x15f   : > { %v440_v8 = vpop.permute.xlu1 %439 }
 0x167   : > { %v406_v9 = vpop.permute.xlu1 %405 }
 0x168   : > { %v446_v10 = vpop.permute.xlu0 %445  ;;  %940 = vmatpush.xpose.msk.msra.mxu1 %vm407_vm1, %v406_v9 }
 0x169   : > { %944 = vmatpush.xpose.msk.msra.mxu2 %vm407_vm1, %v446_v10 }
 0x16c   : > { %941 = vmatpush.xpose.msk.msra.mxu1 %vm407_vm1, %v404_v11 }
 0x16f   : > { %942 = vmatmul.msk.f32.vlgmr.msra.gmra.mxu1 %vm407_vm1, %v1750_v6 }
 0x170   : > { %v444_v12 = vpop.permute.xlu0 %443 }
 0x171   : > { %945 = vmatpush.xpose.msk.msra.mxu2 %vm407_vm1, %v444_v12 }
 0x174   : > { %946 = vmatmul.msk.f32.vlgmr.msra.gmra.mxu2 %vm407_vm1, %v440_v8 }
 0x177   : > { %943 = vmatmul.msk.f32.gmra.mxu1 %vm407_vm1, %v1754_v7 }
 0x17c   : > { %947 = vmatmul.msk.f32.gmra.mxu2 %vm407_vm1, %v442_v13 }
 0x1ec   : > { %v433_v14 = vpop.f32.mrf.mxu1 }
 0x1ed   : > { %v479_v20 = vsel %vm478_vm2, %v433_v14, -inf }
 0x1f4   : > { %v436_v15 = vpop.f32.mrf.mxu1 }
 0x1f5   : > { %v482_v16 = vsel %vm478_vm2, %v436_v15, -inf }
 0x1f6   : > { %483 = vmax.xlane.f32.xlu1 %v482_v16 }
 0x1f7   : > { %v472_v17 = vpop.f32.mrf.mxu2 }
 0x1f8   : > { %v485_v18 = vsel %vm478_vm2, %v472_v17, -inf }
 0x1f9   : > { %486 = vmax.xlane.f32.xlu2 %v485_v18 }
 0x1ff   : > { %v475_v19 = vpop.f32.mrf.mxu2 }
 0x200   : > { %v488_v21 = vsel %vm478_vm2, %v475_v19, -inf }
 0x201   : > { %480 = vmax.xlane.f32.xlu2 %v479_v20  ;;  %489 = vmax.xlane.f32.xlu0 %v488_v21 }
 0x269   : > { %v484_v22 = vpop.xlane.xlu1 %483 }
 0x26a   : > { %v492_v23 = vsub.f32 %v436_v15, %v484_v22 }
 0x26c   : > { %v497_v24 = vmul.f32 1.442695, %v492_v23  ;;  %v487_v25 = vpop.xlane.xlu2 %486 }
 0x26d   : > { %v493_v26 = vsub.f32 %v472_v17, %v487_v25 }
 0x26e   : > { %1135 = vpow2.f32 %v497_v24  ;;  %v576_v24 = vstv %s1788_s19 }
 0x26f   : > { %v499_v27 = vmul.f32 1.442695, %v493_v26 }
 0x271   : > { %1137 = vpow2.f32 %v499_v27 }
 0x274   : > { %v1766_v28 = vpop.eup %1135  ;;  %v490_v29 = vpop.xlane.xlu0 %489 }
 0x275   : > { %v481_v30 = vpop.xlane.xlu2 %480  ;;  %v494_v31 = vsub.f32 %v475_v19, %v490_v29  ;;  %v506_v32 = vsel %vm478_vm2, %v1766_v28, 0.0 }
 0x276   : > { %507 = vadd.xlane.f32.xlu1 %v506_v32  ;;  %v491_v35 = vsub.f32 %v433_v14, %v481_v30 }
 0x277   : > { %v1770_v33 = vpop.eup %1137  ;;  %v501_v34 = vmul.f32 1.442695, %v494_v31 }
 0x278   : > { %v509_v36 = vsel %vm478_vm2, %v1770_v33, 0.0  ;;  %v495_v37 = vmul.f32 1.442695, %v491_v35 }
 0x279   : > { %510 = vadd.xlane.f32.xlu2 %v509_v36  ;;  %1139 = vpow2.f32 %v501_v34 }
 0x27a   : > { %1141 = vpow2.f32 %v495_v37 }
 0x27f   : > { %v1774_v38 = vpop.eup %1139 }
 0x280   : > { %v512_v39 = vsel %vm478_vm2, %v1774_v38, 0.0  ;;  %v1778_v40 = vpop.eup %1141 }
 0x281   : > { %513 = vadd.xlane.f32.xlu0 %v512_v39  ;;  %v503_v41 = vsel %vm478_vm2, %v1778_v40, 0.0 }
 0x289   : > { %504 = vadd.xlane.f32.xlu0 %v503_v41 }
 0x28f   : > { %1131 = vrot.lane.b32.xlu1 %v1130_v42, %s1456_s21 }
 0x2e9   : > { %v508_v43 = vpop.xlane.xlu1 %507 }
 0x2ea   : > { %1143 = vrcp.f32 %v508_v43  ;;  %vm535_vm4 = vweird.f32 %v508_v43  ;;  %v541_v58 = vand.u32 2147483648, %v508_v43  ;;  %v539_v60 = vand.u32 2147483647, %v508_v43 }
 0x2ec   : > { %v511_v44 = vpop.xlane.xlu2 %510  ;;  %v542_v6 = vor.u32 1.1754944e-38, %v541_v58  ;;  %vm540_vm11 = vcmp.eq.f32.partialorder %v539_v60, 8.507059e+37 }
 0x2ed   : > { %1145 = vrcp.f32 %v511_v44  ;;  %vm550_vm8 = vweird.f32 %v511_v44  ;;  %v556_v3 = vand.u32 2147483648, %v511_v44  ;;  %v554_v8 = vand.u32 2147483647, %v511_v44 }
 0x2ef   : > { %v557_v17 = vor.u32 1.1754944e-38, %v556_v3  ;;  %vm555_vm14 = vcmp.eq.f32.partialorder %v554_v8, 8.507059e+37 }
 0x2f0   : > { %v1144_v45 = vpop.eup %1143 }
 0x2f1   : > { %v531_v46 = vmul.f32 %v1144_v45, %v508_v43  ;;  %vm536_vm3 = vweird.f32 %v1144_v45 }
 0x2f2   : > { %vm1790_vm6 = vmor %vm535_vm4, %vm536_vm3 }
 0x2f3   : > { %v1146_v47 = vpop.eup %1145  ;;  %v532_v50 = vsub.f32 1.0, %v531_v46 }
 0x2f4   : > { %v546_v48 = vmul.f32 %v1146_v47, %v511_v44  ;;  %v514_v49 = vpop.xlane.xlu0 %513  ;;  %vm551_vm5 = vweird.f32 %v1146_v47  ;;  %v1457_v44 = vmov 16.0  }
 0x2f5   : > { %1147 = vrcp.f32 %v514_v49  ;;  %v533_v52 = vmul.f32 %v1144_v45, %v532_v50  ;;  %v569_v61 = vand.u32 2147483647, %v514_v49  ;;  %v571_v62 = vand.u32 2147483648, %v514_v49  ;;  %vm1796_vm9 = vmor %vm550_vm8, %vm551_vm5 }
 0x2f6   : > { %v547_v51 = vsub.f32 1.0, %v546_v48  ;;  %vm565_vm10 = vweird.f32 %v514_v49 }
 0x2f7   : > { %v534_v57 = vadd.f32 %v1144_v45, %v533_v52  ;;  %vm570_vm13 = vcmp.eq.f32.partialorder %v569_v61, 8.507059e+37  ;;  %v572_v11 = vor.u32 1.1754944e-38, %v571_v62 }
 0x2f8   : > { %v548_v54 = vmul.f32 %v1146_v47, %v547_v51 }
 0x2f9   : > { %v538_v5 = vsel %vm1790_vm6, %v1144_v45, %v534_v57 }
 0x2fa   : > { %v549_v0 = vadd.f32 %v1146_v47, %v548_v54  ;;  %v543_v15 = vsel %vm540_vm11, %v542_v6, %v538_v5 }
 0x2fb   : > { %v1148_v53 = vpop.eup %1147  ;;  %v544_v22 = vmul.f32 %v1766_v28, %v543_v15 }
 0x2fc   : > { %v561_v55 = vmul.f32 %v1148_v53, %v514_v49  ;;  %v1784_v56 = vpop.xlane.xlu0 %504  ;;  %vm566_vm7 = vweird.f32 %v1148_v53  ;;  %v553_v13 = vsel %vm1796_vm9, %v1146_v47, %v549_v0 }
 0x2fd   : > { %1149 = vrcp.f32 %v1784_v56  ;;  %vm567_vm12 = vmor %vm565_vm10, %vm566_vm7  ;;  %v526_v21 = vand.u32 2147483648, %v1784_v56  ;;  %v558_v23 = vsel %vm555_vm14, %v557_v17, %v553_v13  ;;  %v524_v26 = vand.u32 2147483647, %v1784_v56 }
 0x2fe   : > { %v562_v59 = vsub.f32 1.0, %v561_v55  ;;  %vm520_vm1 = vweird.f32 %v1784_v56  ;;  %v559_v30 = vmul.f32 %v1770_v33, %v558_v23  ;;  %1151 = vrcp.f32 %v1457_v44 }
 0x2ff   : > { %v527_v32 = vor.u32 1.1754944e-38, %v526_v21  ;;  %vm525_vm4 = vcmp.eq.f32.partialorder %v524_v26, 8.507059e+37 }
 0x300   : > { %v563_v1 = vmul.f32 %v1148_v53, %v562_v59  ;;  %v577_v35 = vmul.f32 %v576_v24, %v559_v30 }
 0x301   : > { %v1132_v2 = vpop.permute.xlu1 %1131 }
 0x302   : > { %v1133_v4 = vunpack.i.l.bf16 %v1132_v2  ;;  %v564_v9 = vadd.f32 %v1148_v53, %v563_v1  ;;  %v1134_v12 = vunpack.i.h.bf16 %v1132_v2 }
 0x303   : > { %v1150_v10 = vpop.eup %1149 }
 0x304   : > { %609 = vmatpush.msrb.mxu0 %v1133_v4  ;;  %966 = vmatpush.msra.mxu3 %v1133_v4  ;;  %v516_v14 = vmul.f32 %v1150_v10, %v1784_v56  ;;  %v568_v16 = vsel %vm567_vm12, %v1148_v53, %v564_v9  ;;  %vm521_vm15 = vweird.f32 %v1150_v10  ;;  %v1152_v45 = vpop.eup %1151 }
 0x305   : > { %v573_v18 = vsel %vm570_vm13, %v572_v11, %v568_v16  ;;  %vm522_vm3 = vmor %vm520_vm1, %vm521_vm15  ;;  %v627_v46 = vmul.f32 16.0, %v1152_v45  ;;  %vm631_vm5 = vweird.f32 %v1152_v45 }
 0x306   : > { %610 = vmatpush.msrb.mxu0 %v1134_v12  ;;  %967 = vmatpush.msra.mxu3 %v1134_v12  ;;  %v517_v19 = vsub.f32 1.0, %v516_v14  ;;  %v574_v20 = vmul.f32 %v1774_v38, %v573_v18 }
 0x308   : > { %v518_v25 = vmul.f32 %v1150_v10, %v517_v19  ;;  %v578_v27 = vmul.f32 %v576_v24, %v574_v20 }
 0x30a   : > { %v519_v29 = vadd.f32 %v1150_v10, %v518_v25  ;;  %v580_v31 = vsub.f32 %v544_v22, %v578_v27 }
 0x30c   : > { %v523_v34 = vsel %vm522_vm3, %v1150_v10, %v519_v29  ;;  %582 = vst.msk [vmem:[%s1813_s10 + $0x8] sm:$0xff] %vm478_vm2, %v580_v31  ;;  %949 = vmatmul.msk.f32.vlgmr.msra.gmra.mxu3 %vm478_vm2, %v580_v31 }
 0x30d   : > { %v528_v28 = vsel %vm525_vm4, %v527_v32, %v523_v34 }
 0x30e   : > { %v529_v36 = vmul.f32 %v1778_v40, %v528_v28  ;;  %v628_v40 = vsub.f32 1.0, %v627_v46 }
 0x310   : > { %v579_v37 = vsub.f32 %v529_v36, %v577_v35  ;;  %v629_v47 = vmul.f32 %v1152_v45, %v628_v40 }
 0x312   : > { %581 = vst.msk [vmem:[%s1813_s10] sm:$0xff] %vm478_vm2, %v579_v37  ;;  %948 = vmatmul.msk.f32.vlgmr.msrb.gmra.mxu0 %vm478_vm2, %v579_v37  ;;  %v630_v48 = vadd.f32 %v1152_v45, %v629_v47 }
 0x314   : > { %v632_v49 = vsel %vm631_vm5, %v1152_v45, %v630_v48 }
 0x38f   : > { %v612_v33 = vpop.f32.mrf.mxu0  ;;  %v615_v38 = vpop.f32.mrf.mxu3 }
 0x390   : > { %v618_v39 = vmul.f32 %v612_v33, %v612_v33  ;;  %v619_v41 = vmul.f32 %v615_v38, %v615_v38 }
 0x392   : > { %v623_v42 = vsel %vm478_vm2, %v619_v41, 0.0  ;;  %v620_v43 = vsel %vm478_vm2, %v618_v39, 0.0 }
 0x393   : > { %624 = vadd.xlane.f32.xlu0 %v623_v42  ;;  %621 = vadd.xlane.f32.xlu2 %v620_v43 }
 0x406   : > { %v622_v50 = vpop.xlane.xlu2 %621  ;;  %v625_v51 = vpop.xlane.xlu0 %624 }
 0x407   : > { %v633_v52 = vmul.f32 %v632_v49, %v622_v50  ;;  %v634_v53 = vmul.f32 %v632_v49, %v625_v51 }
 0x409   : > { %v635_v54 = vadd.f32 1e-06, %v633_v52  ;;  %v636_v55 = vadd.f32 1e-06, %v634_v53 }
 0x40b   : > { %1153 = vrsqrt.f32 %v635_v54  ;;  %vm643_vm8 = vweird.f32 %v635_v54  ;;  %vm653_vm10 = vweird.f32 %v636_v55 }
 0x40c   : > { %1155 = vrsqrt.f32 %v636_v55 }
 0x411   : > { %v1154_v56 = vpop.eup %1153 }
 0x412   : > { %v1156_v57 = vpop.eup %1155  ;;  %v638_v58 = vmul.f32 %v1154_v56, %v635_v54  ;;  %vm644_vm6 = vweird.f32 %v1154_v56 }
 0x413   : > { %v648_v59 = vmul.f32 %v1156_v57, %v636_v55  ;;  %vm654_vm7 = vweird.f32 %v1156_v57  ;;  %vm645_vm9 = vmor %vm643_vm8, %vm644_vm6 }
 0x414   : > { %v639_v60 = vmul.f32 %v1154_v56, %v638_v58  ;;  %vm655_vm11 = vmor %vm653_vm10, %vm654_vm7 }
 0x415   : > { %v649_v61 = vmul.f32 %v1156_v57, %v648_v59 }
 0x416   : > { %v640_v62 = vmul.f32 0.5, %v639_v60 }
 0x417   : > { %v650_v63 = vmul.f32 0.5, %v649_v61 }
 0x418   : > { %v641_v0 = vsub.f32 1.5, %v640_v62 }
 0x419   : > { %v651_v1 = vsub.f32 1.5, %v650_v63 }
 0x41a   : > { %v642_v2 = vmul.f32 %v1154_v56, %v641_v0  ;;  %662 = sbr.rel (%p950_p6) target bundleno = 1058 (0x422), region = 56 }
 0x41b   : > { %v652_v3 = vmul.f32 %v1156_v57, %v651_v1 }
 0x41c   : > { %v646_v4 = vsel %vm645_vm9, %v1154_v56, %v642_v2 }
 0x41d   : > { %v657_v5 = vmul.f32 %v646_v4, %v612_v33  ;;  %v656_v6 = vsel %vm655_vm11, %v1156_v57, %v652_v3 }
 0x41e   : > { %v658_v7 = vmul.f32 %v656_v6, %v615_v38 }
 0x41f   : > { %v1458_v8 = vmov 0.0  }
 0x420   : > { %663 = vst.msk [vmem:[%s1826_s17] sm:$0xff] %vm371_vm0, %v1458_v8 }
 0x421   : > { %664 = vst.msk [vmem:[%s1826_s17 + $0x8] sm:$0xff] %vm371_vm0, %v1458_v8 }
 0x422 PF: > { %s2027_s5 = sld [smem:[#allocation23_spill]]  ;;  %v668_v9 = vld [vmem:[%s321_s11 + $0x8] sm:$0xff]  ;;  %v667_v10 = vld [vmem:[%s321_s11] sm:$0xff]  ;;  %s739_s0 = sshll.u32 %s1813_s10, 4  ;;  %s740_s0 = int_to_ptr.vmem [resolvable:$true] %s739_s0 }
 0x423   : > { %s2028_s16 = sld [smem:[#allocation24_spill]]  ;;  %689 = vmatpush.msrb.mxu3 %v668_v9  ;;  %s708_s23 = scalar_lea.sflag [#allocation12], %s362_s27 }
 0x424   : > { %s2031_s2 = sld [smem:[#allocation37_spill]] }
 0x425   : > { %690 = vmatpush.msrb.mxu3 %v667_v10 }
 0x426   : > { %951 = vmatmul.msk.f32.vlgmr.msrb.gmra.mxu3 %vm478_vm2, %v657_v5 }
 0x428   : > { %s957_s28 = sshll.u32 %s2027_s5, 1 }
 0x429   : > { %s958_s18 = sshll.u32 %s2028_s16, 3 }
 0x42a   : > { %s736_s13 = sadd.s32 %s958_s18, %s957_s28  ;;  %s1282_s18 = scalar_lea.hbm %s2031_s2, 128 }
 0x42b   : > { %s959_s24 = sshll.u32 %s736_s13, 3 }
 0x42c   : > { %s738_s19 = scalar_lea.hbm %s2031_s2, %s959_s24 }
 0x42d   : > { %s741_s4 = sshll.u32 %s738_s19, 4  ;;  %s742_s4 = int_to_ptr.hbm [resolvable:$true] %s741_s4 }
 0x42e   : > { %952 = vmatmul.msk.f32.gmra.mxu3 %vm478_vm2, %v658_v7  ;;  %s1276_s11 = sshra.s32 %s742_s4, 4  ;;  %s1277_s11 = int_to_ptr.hbm [resolvable:$true] %s1276_s11 }
 0x42f   : > { %s1278_s1 = scalar_lea.hbm %s1277_s11, 16  ;;  %p1283_p9 = scmp.lt.s32.totalorder %s1277_s11, %s2031_s2 }
 0x430   : > { %p1279_p11 = scmp.ne.s32.totalorder %s1277_s11, %s1278_s1  ;;  %p1284_p10 = scmp.lt.s32.totalorder %s1282_s18, %s1278_s1 }
 0x432   : > { %p1280_p13 = pnand %p1279_p11, %p1647_p0  ;;  %p1285_p1 = por %p1284_p10, %p1283_p9 }
 0x434   : > { %p1281_p7 = pneg %p1280_p13 }
 0x436   : > { %p1286_p2 = pnand %p1285_p1, %p1281_p7 }
 0x438   : > { %1289 = shalt.err (!%p1286_p2)
}
 0x439   : > { %s1459_s27 = smov 128   ;;  %s1460_s10 = smov 8   ;;  %v665_v11 = vld [vmem:[%s1826_s17] sm:$0xff]  ;;  %v666_v14 = vld [vmem:[%s1826_s17 + $0x8] sm:$0xff] }
 0x43a   : > { %979 = dma.vmem_to_hbm [thread:$0]  (%p1647_p0), %s740_s0, 256, %s742_s4, %s708_s23, %s1459_s27, %s1459_s27, %s1460_s10  }
 0x43b   : > { %s965_s1 = sshll.u32 %s2028_s16, 4  ;;  %s2033_s19 = sld [smem:[#allocation36_spill]] }
 0x43c   : > { %s720_s28 = sshll.u32 %s1826_s17, 4  ;;  %s703_s9 = scalar_lea.sflag [#allocation4], %s1729_s22  ;;  %s721_s28 = int_to_ptr.vmem [resolvable:$true] %s720_s28 }
 0x441   : > { %s2034_s11 = smov %s2033_s19  ;;  %s719_s5 = scalar_lea.hbm %s2033_s19, %s965_s1 }
 0x442   : > { %s722_s18 = sshll.u32 %s719_s5, 4  ;;  %s1310_s13 = scalar_lea.hbm %s2034_s11, 32  ;;  %s723_s18 = int_to_ptr.hbm [resolvable:$true] %s722_s18 }
 0x443   : > { %s1304_s0 = sshra.s32 %s723_s18, 4  ;;  %s1305_s0 = int_to_ptr.hbm [resolvable:$true] %s1304_s0 }
 0x444   : > { %s1306_s16 = scalar_lea.hbm %s1305_s0, 16  ;;  %p1311_p4 = scmp.lt.s32.totalorder %s1305_s0, %s2034_s11 }
 0x445   : > { %p1307_p0 = scmp.ne.s32.totalorder %s1305_s0, %s1306_s16  ;;  %p1312_p5 = scmp.lt.s32.totalorder %s1310_s13, %s1306_s16 }
 0x447   : > { %p1308_p3 = pnand %p1307_p0, %p1682_p8  ;;  %p1313_p6 = por %p1312_p5, %p1311_p4 }
 0x449   : > { %p1309_p12 = pneg %p1308_p3 }
 0x44b   : > { %p1314_p11 = pnand %p1313_p6, %p1309_p12 }
 0x4a9   : > { %v692_v12 = vpop.f32.mrf.mxu3 }
 0x4aa   : > { %v698_v13 = vadd.f32 %v692_v12, %v665_v11 }
 0x4ac   : > { %700 = vst.msk [vmem:[%s1826_s17] sm:$0xff] %vm371_vm0, %v698_v13 }
 0x4b1   : > { %v695_v15 = vpop.f32.mrf.mxu3 }
 0x4b2   : > { %v699_v16 = vadd.f32 %v695_v15, %v666_v14 }
 0x4b4   : > { %701 = vst.msk [vmem:[%s1826_s17 + $0x8] sm:$0xff] %vm371_vm0, %v699_v16 }
 0x4b5   : > { %1317 = shalt.err (!%p1314_p11)
}
 0x4b6   : > { %978 = dma.vmem_to_hbm [thread:$0]  (%p1682_p8), %s721_s28, 256, %s723_s18, %s703_s9, %s1459_s27, %s1459_s27, %s1460_s10  }
 0x4b7 PF: > { %s2035_s22 = sld [smem:[#allocation22_spill]]  ;;  %p1006_p13 = scmp.ge.s32.totalorder %s1448_s6, 2 }
 0x4b8   : > { %s2036_s17 = sld [smem:[#allocation29_spill]] }
 0x4bd   : > { %s756_s24 = sand.u32 1, %s2035_s22  }
 0x4be   : > { %p2037_p7 = scmp.ne.s32.totalorder %s2036_s17, 0  ;;  %s757_s21 = scalar_lea.sflag [#allocation4], %s756_s24 }
 0x4c0   : > { %p997_p9 = pnand %p1006_p13, %p2037_p7 }
 0x4c2   : > { %p998_p10 = pneg %p997_p9 }
 0x4c4   : > { %1387 = dma.done.wait (%p998_p10), %s757_s21, 256  }
 0x4c5   : > { %1389 = vsyncadd (%p998_p10), %s757_s21, 4294967040  ;;  %s2038_s19 = sld [smem:[#allocation18_spill]] }
 0x4c6   : > { %s2039_s5 = sld [smem:[#allocation31_spill]] }
 0x4cb   : > { %s766_s0 = sand.u32 1, %s2038_s19  }
 0x4cc   : > { %p2040_p1 = scmp.ne.s32.totalorder %s2039_s5, 0  ;;  %s767_s12 = scalar_lea.sflag [#allocation12], %s766_s0 }
 0x4ce   : > { %p1000_p2 = pnand %p1006_p13, %p2040_p1 }
 0x4d0   : > { %p1001_p0 = pneg %p1000_p2 }
 0x4d2   : > { %1391 = dma.done.wait (%p1001_p0), %s767_s12, 256  }
 0x4d3   : > { %1393 = vsyncadd (%p1001_p0), %s767_s12, 4294967040  ;;  %s29_s6 = sadd.s32 1, %s1448_s6   ;;  %s2042_s18 = sld [smem:[#allocation19_spill]] }
 0x4d4   : > { %p1893_p8 = scmp.ge.s32.totalorder %s29_s6, 10   ;;  %s2043_s21 = sld [smem:[#allocation20_spill]] }
 0x4d5   : > { %s2044_s22 = sld [smem:[#allocation21_spill]]  ;;  %s2048_s19 = smov %s1404_s20 }
 0x4d6   : > { %s2045_s23 = sld [smem:[#allocation26_spill]]  ;;  %s2049_s20 = smov %s1702_s7 }
 0x4d7   : > { %s2046_s10 = sld [smem:[#allocation25_spill]]  ;;  %s2050_s24 = smov %s1424_s25 }
 0x4d8   : > { %s2051_s25 = smov %s1428_s26  ;;  %s2052_s26 = smov %s1697_s15 }
 0x4d9   : > { %s2053_s27 = smov %s1440_s29  ;;  %s2054_s28 = smov %s1444_s30 }
 0x4da   : > { %s2056_s30 = smov %s2062_s14  ;;  %28 = sbr.rel (!%p1893_p8) target bundleno = 21 (0x15), region = 131 }
 0x4dd   : > { %s2055_s29 = smov %s2046_s10 }
 0x4df   :  { %773 = vsyncpa [#allocation3], 1 }
 0x4e0   :  { %775 = vsyncpa [#allocation3 + $0x1], 1 }
 0x4e1   :  { %776 = vsyncpa [#allocation8], 1 }
 0x4e2   :  { %778 = vsyncpa [#allocation8 + $0x1], 1 }
 0x4e3   :  { %779 = vsyncpa [#allocation4], 1 }
 0x4e4   :  { %781 = vsyncpa [#allocation4 + $0x1], 1 }
 0x4e5   :  { %782 = vsyncpa [#allocation12], 1 }
 0x4e6   :  { %784 = vsyncpa [#allocation12 + $0x1], 1 }
 0x4e7   :  { %785 = vsyncpa [#allocation5], 1 }
 0x4e8   :  { %787 = vsyncpa [#allocation5 + $0x1], 1 }

</bundles_post_ra>
